<compile_context>
chip_gen: v6e
topology: v6e:2x2x1
jax: 0.10.0
libtpu: 0.0.40
codegen_flags: <defaults>
</compile_context>

<pallas_src>
import jax
import jax.numpy as jnp
import numpy as np
from jax.experimental import pallas as pl
from jax.experimental.pallas import tpu as pltpu

_MAX_BLOCK_ROWS = 128      # rows gathered per grid step (cap)
_RESIDENT_MAX_ROWS = 4096  # keeps the (TB, N) one-hot operand small


def _sublane_pack(dtype) -> int:
    """Rows per packed sublane group: 8 for 32-bit, 16 for bf16, 32 for int8."""
    itemsize = jnp.dtype(dtype).itemsize
    return 8 * max(1, 4 // itemsize)


def _vmem_capacity_bytes() -> int:
    """Physical VMEM of the local generation; conservative default on failure."""
    try:
        cap = int(pltpu.get_tpu_info().vmem_capacity_bytes)
        if cap > 0:
            return cap
    except Exception:
        pass
    return 64 * 1024 * 1024  # v7x per-TensorCore figure (most restrictive)


def _gather_onehot_kernel(ids_ref, y_ref, out_ref):
    """VMEM-resident table; gather TB rows per step via one-hot MXU matmul.

    ids_ref : VMEM (TB, 1) int32   (this step's ids)
    y_ref   : VMEM (N, Dp)         (same block every step -> stays resident)
    out_ref : VMEM (TB, Dp)
    """
    tb = out_ref.shape[0]
    n = y_ref.shape[0]
    row_ids = jax.lax.broadcasted_iota(jnp.int32, (tb, n), 1)
    onehot = (row_ids == ids_ref[...]).astype(y_ref.dtype)        # (TB, N)
    out_ref[...] = jnp.dot(
        onehot, y_ref[...], preferred_element_type=jnp.float32
    ).astype(out_ref.dtype)                                        # one dense store


def _gather_dma_kernel(ids_ref, y_hbm_ref, out_ref, sem):
    """Manual HBM gather: TB concurrent row DMAs straight into the out block.

    ids_ref   : SMEM (B_pad,) int32   (scalar-prefetched)
    y_hbm_ref : HBM  (N, D)           (memory_space=pl.ANY, no auto-DMA)
    out_ref   : VMEM (TB, D)          (pipeline writes it back to HBM)
    sem       : DMA semaphores (1,)   (shared; each wait retires one row)
    """
    tb = out_ref.shape[0]
    base = pl.multiple_of(pl.program_id(0) * tb, tb)

    copies = []
    for r in range(tb):                      # static unroll; all DMAs in flight
        idx = ids_ref[base + r]
        cp = pltpu.make_async_copy(
            y_hbm_ref.at[pl.ds(idx, 1)], out_ref.at[pl.ds(r, 1)], sem.at[0]
        )
        cp.start()
        copies.append(cp)
    for cp in copies:                        # wait on the same descriptors
        cp.wait()


def array_forward(y: jax.Array, ids: jax.Array, output_key=None,
                  *, block_rows=None, use_resident=None):
    """Pallas equivalent of Array.forward({'x': ids})."""
    y = jnp.asarray(y)
    ids = jnp.asarray(ids).astype(jnp.int32)
    orig_shape = ids.shape
    ids = ids.reshape(-1)

    B = ids.shape[0]
    N, D = y.shape
    itemsize = jnp.dtype(y.dtype).itemsize

    if B == 0:
        out = jnp.zeros(orig_shape + (D,), dtype=y.dtype)
        return out if output_key is None else {output_key: out}

    # TODO(synk): PyTorch's y[ids] raises on out-of-bounds ids; here we clamp so
    # a bad id can never drive an out-of-bounds DMA / gather.
    ids = jnp.clip(ids, 0, N - 1)

    # Rows gathered per grid step: a multiple of the sublane packing so the
    # (TB, D) output block is sublane-dense (unmasked stores).
    pack = _sublane_pack(y.dtype)
    if block_rows is None:
        tb = min(_MAX_BLOCK_ROWS, -(-B // pack) * pack)
    else:
        tb = -(-int(block_rows) // pack) * pack      # round UP to the pack
    tb = max(tb, pack)

    num_blocks = -(-B // tb)
    B_pad = num_blocks * tb
    if B_pad != B:
        ids = jnp.pad(ids, (0, B_pad - B))           # padded ids are 0 -> valid row

    vmem_cap = _vmem_capacity_bytes()
    d_pad = -(-D // 128) * 128                       # lane-dense output width
    table_bytes = N * d_pad * itemsize

    if use_resident is None:
        # Resident one-hot path: float tables only (MXU; v7x has no integer MXU
        # path) that fit comfortably in this generation's VMEM.  The table block
        # is double-buffered by the pipeline even though its index is constant,
        # so budget 2x.
        # TODO(synk): switch the table BlockSpec to pipeline_mode=pl.Buffered(1)
        # (single buffer) once verified on this JAX version, and raise the
        # threshold accordingly.
        use_resident = (
            jnp.issubdtype(y.dtype, jnp.floating)
            and itemsize in (2, 4)
            and N <= _RESIDENT_MAX_ROWS
            and table_bytes <= vmem_cap // 4
        )

    if use_resident:
        y_use = y if d_pad == D else jnp.pad(y, ((0, 0), (0, d_pad - D)))
        ids_2d = ids.reshape(B_pad, 1)
        vmem_need = (
            2 * table_bytes                          # resident table (x2 buffers)
            + 2 * tb * d_pad * itemsize              # output double buffer
            + 2 * tb * 128 * 4                       # (TB, 1) ids blocks (lane-padded)
            + 2 * tb * max(N, 128) * 4               # one-hot operand headroom
            + (4 << 20)                              # misc scratch / spills
        )
        vmem_limit = int(min(max(vmem_need, 16 << 20), vmem_cap * 3 // 4))
        out = pl.pallas_call(
            _gather_onehot_kernel,
            out_shape=jax.ShapeDtypeStruct((B_pad, d_pad), y.dtype),
            grid=(num_blocks,),
            in_specs=[
                pl.BlockSpec((tb, 1), lambda i: (i, 0)),       # this step's ids
                pl.BlockSpec((N, d_pad), lambda i: (0, 0)),    # resident table
            ],
            out_specs=pl.BlockSpec((tb, d_pad), lambda i: (i, 0)),
            compiler_params=pltpu.CompilerParams(
                dimension_semantics=("parallel",),
                vmem_limit_bytes=vmem_limit,
            ),
        )(ids_2d, y_use)
        out = out[:B, :D]
    else:
        # TODO(synk): for D % 128 != 0 the output stores are lane-masked; a
        # lane-dense repack is only worthwhile for very large gathers.
        # TODO(synk): scalar-prefetching all ids bounds B by SMEM capacity;
        # switch to a blocked SMEM ids input for multi-million-row batches.
        out = pl.pallas_call(
            _gather_dma_kernel,
            out_shape=jax.ShapeDtypeStruct((B_pad, D), y.dtype),
            grid_spec=pltpu.PrefetchScalarGridSpec(
                num_scalar_prefetch=1,                        # ids -> SMEM
                grid=(num_blocks,),
                in_specs=[pl.BlockSpec(memory_space=pl.ANY)],  # y stays in HBM
                out_specs=pl.BlockSpec((tb, D), lambda i, ids_ref: (i, 0)),
                scratch_shapes=[pltpu.SemaphoreType.DMA((1,))],
            ),
            compiler_params=pltpu.CompilerParams(
                dimension_semantics=("parallel",),
            ),
        )(ids, y)
        out = out[:B]

    out = out.reshape(orig_shape + (D,))
    if output_key is None:
        return out
    return {output_key: out}


if __name__ == "__main__":
    key = jax.random.PRNGKey(0)
    k_y, k_ids, k_ids2, k_y3, k_ids3 = jax.random.split(key, 5)

    # Deterministic synthetic "parameter" table (stands in for np.ndarray y).
    N, D = 16, 128          # table rows, feature width
    B = 8                   # batch of indices
    y = jax.random.normal(k_y, (N, D), dtype=jnp.float32)
    ids = jax.random.randint(k_ids, (B,), 0, N, dtype=jnp.int32)
    ref = np.asarray(y)[np.asarray(ids)]

    # 1) Default dispatch (small f32 table -> VMEM-resident one-hot matmul path).
    out = jax.block_until_ready(array_forward(y, ids, output_key=None))
    assert out.shape == (B, D) and out.dtype == y.dtype
    assert np.allclose(np.asarray(out), ref)

    # 2) Forced HBM manual-DMA gather path.
    out_dma = jax.block_until_ready(
        array_forward(y, ids, output_key=None, use_resident=False))
    assert np.allclose(np.asarray(out_dma), ref)

    # 3) Dict-output variant (output_key set), as in the PyTorch module.
    out_dict = array_forward(y, ids, output_key="logits")
    jax.block_until_ready(out_dict["logits"])
    assert np.allclose(np.asarray(out_dict["logits"]), ref)

    # 4) Ragged batch (B not a multiple of the row block) -> exercises padding.
    B2 = 13
    ids2 = jax.random.randint(k_ids2, (B2,), 0, N, dtype=jnp.int32)
    out2 = jax.block_until_ready(array_forward(y, ids2))
    assert out2.shape == (B2, D)
    assert np.allclose(np.asarray(out2), np.asarray(y)[np.asarray(ids2)])

    # 5) Narrow feature dim (D < 128 -> lane-padded output) and 2-D ids.
    N3, D3 = 10, 64
    y3 = jax.random.normal(k_y3, (N3, D3), dtype=jnp.float32)
    ids3 = jax.random.randint(k_ids3, (3, 5), 0, N3, dtype=jnp.int32)
    out3 = jax.block_until_ready(array_forward(y3, ids3))
    assert out3.shape == (3, 5, D3)
    assert np.allclose(np.asarray(out3), np.asarray(y3)[np.asarray(ids3)])

    print("KERNEL_OK")
</pallas_src>

<mosaic_0001>
module attributes {stable_mosaic.version = 11 : i64} {
  func.func @_gather_onehot_kernel(%arg0: i32, %arg1: memref<8x1xi32, #tpu.memory_space<vmem>>, %arg2: memref<16x128xf32, #tpu.memory_space<vmem>>, %arg3: memref<8x128xf32, #tpu.memory_space<vmem>>) attributes {dimension_semantics = [#tpu.dimension_semantics<parallel>], iteration_bounds = array<i64: 1>, scalar_prefetch = 0 : i64, scratch_operands = 0 : i64, tpu.core_type = #tpu.core_type<tc>, window_params = [{transform_indices = @transform_0, window_bounds = array<i64: 8, 1>}, {pipeline_mode = #tpu.pipeline_mode<synchronous>, transform_indices = @transform_1, window_bounds = array<i64: 16, 128>}, {transform_indices = @transform_2, window_bounds = array<i64: 8, 128>}]} {
    %0 = tpu.iota {dimensions = array<i32: 1>} : vector<8x16xi32>
    %c0 = arith.constant 0 : index
    %c0_0 = arith.constant 0 : index
    %1 = vector.load %arg1[%c0, %c0_0] : memref<8x1xi32, #tpu.memory_space<vmem>>, vector<8x1xi32>
    %2 = vector.broadcast %1 : vector<8x1xi32> to vector<8x16xi32>
    %3 = arith.cmpi eq, %0, %2 : vector<8x16xi32>
    %4 = arith.extui %3 : vector<8x16xi1> to vector<8x16xi32>
    %5 = arith.sitofp %4 : vector<8x16xi32> to vector<8x16xf32>
    %c0_1 = arith.constant 0 : index
    %c0_2 = arith.constant 0 : index
    %6 = vector.load %arg2[%c0_1, %c0_2] : memref<16x128xf32, #tpu.memory_space<vmem>>, vector<16x128xf32>
    %cst = arith.constant dense<0.000000e+00> : vector<8x128xf32>
    %7 = tpu.matmul %5, %6, %cst {dimension_numbers = #tpu.dot_dimension_numbers<[1], [0], [0], [1], [0, 0, 1, 1], [], []>} : vector<8x16xf32>, vector<16x128xf32>, vector<8x128xf32> -> vector<8x128xf32>
    %c0_3 = arith.constant 0 : index
    %c0_4 = arith.constant 0 : index
    %8 = vector.load %arg3[%c0_3, %c0_4] : memref<8x128xf32, #tpu.memory_space<vmem>>, vector<8x128xf32>
    tpu.vector_store %arg3[%c0_3, %c0_4], %7 {strides = array<i32>} : memref<8x128xf32, #tpu.memory_space<vmem>>, vector<8x128xf32>,
    return
  }
  func.func @transform_0(%arg0: i32) -> (i32, i32) {
    %c0_i32 = arith.constant 0 : i32
    %c0_i32_0 = arith.constant 0 : i32
    return %arg0, %c0_i32 : i32, i32
  }
  func.func @transform_1(%arg0: i32) -> (i32, i32) {
    %c0_i32 = arith.constant 0 : i32
    %c0_i32_0 = arith.constant 0 : i32
    %c0_i32_1 = arith.constant 0 : i32
    return %c0_i32, %c0_i32_0 : i32, i32
  }
  func.func @transform_2(%arg0: i32) -> (i32, i32) {
    %c0_i32 = arith.constant 0 : i32
    %c0_i32_0 = arith.constant 0 : i32
    return %arg0, %c0_i32 : i32, i32
  }
}

</mosaic_0001>

<bundles_post_ra>
// kernel: tpu_custom_call.1
= control target key start
LH: loop header
LB: loop body
LE: loop exit
PB: predicated region body
PF: predicated region fallthrough
CT: control target
= control target key end

     0   :  { %7 = vsyncpa [#allocation3], 0  ;;  %s222_s0 = inlined_call_operand.vmem [shape: s32[8,1], index: 0, kind: input, shape index: {}]   ;;  %s223_s1 = inlined_call_operand.hbm [shape: f32[16,128], index: 1, kind: input, shape index: {}]   ;;  %s224_s2 = inlined_call_operand.hbm [shape: f32[8,128], index: 2, kind: output, shape index: {}]  }
   0x1   :  { %8 = vsyncpa [#allocation4], 0  ;;  %s191_s9 = smov [#allocation2]  }
   0x2   :  { %s16_s10 = sshll.u32 %s191_s9, 4  ;;  %s17_s10 = int_to_ptr.vmem [resolvable:$true] %s16_s10 }
   0x3   :  { %s155_s11 = scalar_lea.vmem %s17_s10, 256  ;;  %p160_p1 = scmp.lt.s32.totalorder %s17_s10, %s17_s10 }
   0x4   :  { %p156_p0 = scmp.ne.s32.totalorder %s17_s10, %s155_s11  ;;  %p161_p2 = scmp.lt.s32.totalorder %s155_s11, %s155_s11 }
   0x6   :  { %p162_p3 = por %p161_p2, %p160_p1 }
   0x8   :  { %p163_p4 = pnand %p162_p3, %p156_p0 }
   0xa   :  { %166 = shalt.err (!%p163_p4)
}
   0xb   :  { %s192_s12 = smov 128   ;;  %s193_s13 = smov 8  }
   0xc   :  { %22 = dma.hbm_to_vmem [thread:$0]  %s223_s1, 256, %s17_s10, [#allocation3], %s192_s12, %s192_s12, %s193_s13  }
   0xd   :  { %187 = dma.done.wait [#allocation3], 256  }
   0xe   :  { %188 = vsyncadd [#allocation3], 4294967040  ;;  %v194_v0 = vmov 0   ;;  %v195_v1 = vmov 0.0   ;;  %vm196_vm0 = vmmov 0   ;;  %v28_v2 = vld [vmem:[%s222_s0] sm:$0xff]  ;;  %v26_v5 = vlaneseq }
   0xf   :  { %146 = vset.pattern.permute.xlu0 %v194_v0  ;;  %132 = vmatprep.subr.mxu0 %v195_v1  ;;  %v36_v3 = vld [vmem:[#allocation2 + $0x8] sm:$0xff]  ;;  %v35_v4 = vld [vmem:[#allocation2] sm:$0xff]  ;;  %vm37_vm1 = vcmask 130048   ;;  %s197_s1 = smov [#allocation5]  }
  0x10   :  { %136 = vmatprep.mubr.msk.f32.mxu0 %vm196_vm0, %v195_v1  ;;  %30 = vperm.xlu0 %146, %v28_v2   ;;  %v27_v6 = vand.u32 127, %v26_v5  ;;  %s118_s18 = sshll.u32 %s197_s1, 4  ;;  %s119_s18 = int_to_ptr.vmem [resolvable:$true] %s118_s18 }
  0x11   :  { %133 = vmatpush3.msra.mxu0 %v36_v3  ;;  %s167_s0 = scalar_lea.vmem %s119_s18, 128  ;;  %p172_p6 = scmp.lt.s32.totalorder %s119_s18, %s119_s18 }
  0x12   :  { %134 = vmatprep.subr.mxu0 %v195_v1  ;;  %p168_p5 = scmp.ne.s32.totalorder %s119_s18, %s167_s0  ;;  %p173_p7 = scmp.lt.s32.totalorder %s167_s0, %s167_s0 }
  0x13   :  { %135 = vmatpush3.msra.mxu0 %v35_v4 }
  0x14   :  { %p174_p8 = por %p173_p7, %p172_p6 }
  0x16   :  { %p175_p9 = pnand %p174_p8, %p168_p5 }
  0x8b   :  { %v31_v7 = vpop.permute.xlu0 %30 }
  0x8c   :  { %vm32_vm2 = vcmp.eq.s32.totalorder %v27_v6, %v31_v7 }
  0x8d   :  { %v127_v8 = vsel %vm32_vm2, 1.0, %v195_v1 }
  0x8e   :  { %137 = vmatmul.mubr.msk.f32.vlgmr.msra.gmra.mxu0 %vm37_vm1, %v127_v8 }
 0x14e   :  { %v107_v9 = vpop.f32.mrf.mxu0 }
 0x14f   :  { %111 = vst [vmem:[#allocation5] sm:$0xff] %v107_v9 }
 0x150   :  { %v138_v10 = vpop.f32.mrf.mxu0 }
 0x151   :  { %178 = shalt.err (!%p175_p9)
}
 0x152   :  { %121 = dma.vmem_to_hbm [thread:$0]  %s119_s18, 128, %s224_s2, [#allocation4]  }
 0x153   :  { %189 = dma.done.wait [#allocation4], 128  }
 0x154   :  { %190 = vsyncadd [#allocation4], 4294967168 }
 0x155   :  { %125 = vsyncpa [#allocation3], 1 }
 0x156   :  { %126 = vsyncpa [#allocation4], 1 }

</bundles_post_ra>
